<compile_context>
chip_gen: v6e
topology: v6e:2x2x1
jax: 0.10.0
libtpu: 0.0.40
codegen_flags: <defaults>
</compile_context>

<pallas_src>
import functools

import jax
import jax.numpy as jnp
from jax import lax
from jax.experimental import pallas as pl
from jax.experimental.pallas import tpu as pltpu


def _unary_kernel(x_ref, weT_ref, be_ref, wr_ref, br_ref, seed_ref, out_ref, *,
                  drop_p, apply_dropout, precision):
    """One row-tile step: fused embed + ReLU + dropout + feature_reduce."""
    TL, E = x_ref.shape

    x = x_ref[...]                                                    # (TL, E)

    # ---- embed: 1x1 Conv1d(E->E) == per-position linear (MXU, f32 acc) ----
    h = jnp.dot(x, weT_ref[...], preferred_element_type=jnp.float32,
                precision=precision)                                  # (TL, E) f32
    h = jnp.maximum(h + be_ref[...], 0.0)                             # bias + ReLU

    # ---- dropout (training mode), TPU hardware PRNG ----
    if apply_dropout:
        # Two seed words (call seed, grid step): no overlap between the tile
        # streams of consecutive call seeds.  1/(1-p) rescale folded into wr.
        pltpu.prng_seed(seed_ref[0], pl.program_id(0))
        bits = pltpu.bitcast(pltpu.prng_random_bits((TL, E)), jnp.uint32)
        thresh = jnp.uint32(min(int(round(drop_p * 2.0 ** 32)), 2 ** 32 - 1))
        h = jnp.where(bits >= thresh, h, 0.0)     # integer-threshold keep/zero

    # ---- feature_reduce: 1x1 Conv1d(E->1) as (1,E) @ (TL,E)^T on the MXU ----
    # Result is already a lane-dense (1, TL) row -> unmasked wide stores.
    pot = lax.dot_general(wr_ref[...], h, (((1,), (1,)), ((), ())),
                          preferred_element_type=jnp.float32,
                          precision=precision)                        # (1, TL)
    out_ref[0] = (pot + br_ref[0, 0]).astype(out_ref.dtype)


def unary_forward(X, params, *, drop_p=0.5, deterministic=True, seed=0,
                  block_rows=1024):
    """X: (B, L, E) channels-last -> (B, L) potentials."""
    B, L, E = X.shape
    N = B * L
    itemsize = X.dtype.itemsize
    apply_dropout = (not deterministic) and float(drop_p) > 0.0
    if apply_dropout:
        assert 0.0 < float(drop_p) < 1.0, "drop_p must be in [0, 1)"

    # ---- parameters ----
    weT = params["We"].T.astype(X.dtype)                  # (E_in, E_out) MXU operand
    be = params["be"].reshape(1, E).astype(jnp.float32)   # (1, E)
    wr = params["wr"].astype(jnp.float32)
    if apply_dropout:
        wr = wr / (1.0 - float(drop_p))                   # fold dropout rescale
    wr2 = wr.reshape(1, E)                                # (1, E) reduce weight row
    br = params["br"].reshape(1, 1).astype(jnp.float32)   # scalar -> SMEM
    seed_arr = jnp.asarray([seed], jnp.int32)             # scalar -> SMEM

    # ---- row-tile selection over flattened B*L rows ----
    # Budget the double-buffered X tile + resident weights well inside the
    # scoped-VMEM limit on every generation (v7x physical VMEM is 64 MiB).
    # TODO(synk): very large E (weight alone > budget) would need K-tiling.
    VMEM_BUDGET = 32 * 1024 * 1024
    resident = 2 * E * E * itemsize + 4 * E * 4 + 4096
    max_tl = max((VMEM_BUDGET - resident) // (2 * (E * itemsize + 8)), 128)
    TL = max((min(block_rows, max_tl) // 128) * 128, 128)
    if N <= TL:
        TL = max(8, ((N + 7) // 8) * 8)           # single tile, sublane-aligned
    elif N // TL < 8 and N > 8 * 128:
        TL = max(128, ((N // 8) // 128) * 128)    # keep >=8 steps for megacore
    Np = ((N + TL - 1) // TL) * TL
    G = Np // TL

    Xf = X.reshape(N, E)
    if Np != N:
        Xf = jnp.pad(Xf, ((0, Np - N), (0, 0)))

    prec = lax.Precision.HIGHEST if X.dtype == jnp.float32 else None
    kernel = functools.partial(_unary_kernel, drop_p=float(drop_p),
                               apply_dropout=apply_dropout, precision=prec)

    out = pl.pallas_call(
        kernel,
        grid=(G,),
        in_specs=[
            pl.BlockSpec((TL, E), lambda i: (i, 0)),            # X row tile (pipelined)
            pl.BlockSpec((E, E), lambda i: (0, 0)),             # embed weight^T (resident)
            pl.BlockSpec((1, E), lambda i: (0, 0)),             # embed bias
            pl.BlockSpec((1, E), lambda i: (0, 0)),             # reduce weight row
            pl.BlockSpec(memory_space=pltpu.MemorySpace.SMEM),  # reduce bias (scalar)
            pl.BlockSpec(memory_space=pltpu.MemorySpace.SMEM),  # dropout seed (scalar)
        ],
        out_specs=pl.BlockSpec((1, 1, TL), lambda i: (i, 0, 0)),
        out_shape=jax.ShapeDtypeStruct((G, 1, TL), X.dtype),    # lane-dense row slabs
        compiler_params=pltpu.CompilerParams(
            dimension_semantics=("parallel",),
            vmem_limit_bytes=48 * 1024 * 1024),
    )(Xf, weT, be, wr2, br, seed_arr)

    return out.reshape(Np)[:N].reshape(B, L)


def unary_reference(X, params):
    """Pure-JAX reference (dropout disabled) mirroring the PyTorch forward."""
    hp = lax.Precision.HIGHEST
    h = jnp.einsum('ble,oe->blo', X.astype(jnp.float32), params["We"],
                   precision=hp) + params["be"]
    h = jnp.maximum(h, 0.0)
    out = jnp.einsum('ble,e->bl', h, params["wr"], precision=hp) + params["br"][0]
    return out.astype(X.dtype)


def init_params(key, embed_size):
    ks = jax.random.split(key, 4)
    return {
        "We": 0.1 * jax.random.normal(ks[0], (embed_size, embed_size), jnp.float32),
        "be": 0.1 * jax.random.normal(ks[1], (embed_size,), jnp.float32),
        "wr": 0.1 * jax.random.normal(ks[2], (embed_size,), jnp.float32),
        "br": 0.1 * jax.random.normal(ks[3], (1,), jnp.float32),
    }


if __name__ == "__main__":
    B, L, E = 2, 16, 32     # batch, seq positions, embed_size

    key = jax.random.PRNGKey(0)
    kx, kp = jax.random.split(key)
    X = jax.random.normal(kx, (B, L, E), jnp.float32)
    params = init_params(kp, E)

    # deterministic path (dropout disabled) — numerically checked vs. reference
    out = jax.block_until_ready(unary_forward(X, params, deterministic=True))
    ref = unary_reference(X, params)
    assert out.shape == (B, L)
    max_err = float(jnp.max(jnp.abs(out - ref)))
    assert jnp.allclose(out, ref, atol=2e-3, rtol=2e-3), max_err

    # training-mode dropout uses the TPU hardware PRNG (no CPU/interpret
    # lowering for prng_seed), so only exercise it on real TPU devices.
    if jax.devices()[0].platform == "tpu":
        out_train = jax.block_until_ready(
            unary_forward(X, params, deterministic=False, drop_p=0.5, seed=1234))
        assert out_train.shape == (B, L)
        assert bool(jnp.all(jnp.isfinite(out_train)))

    print("KERNEL_OK")
</pallas_src>

<mosaic_0001>
module attributes {stable_mosaic.version = 11 : i64} {
  func.func @_unary_kernel(%arg0: i32, %arg1: memref<32x32xf32, #tpu.memory_space<vmem>>, %arg2: memref<32x32xf32, #tpu.memory_space<vmem>>, %arg3: memref<1x32xf32, #tpu.memory_space<vmem>>, %arg4: memref<1x32xf32, #tpu.memory_space<vmem>>, %arg5: memref<1x1xf32, #tpu.memory_space<smem>>, %arg6: memref<1xi32, #tpu.memory_space<smem>>, %arg7: memref<1x1x32xf32, #tpu.memory_space<vmem>>) attributes {dimension_semantics = [#tpu.dimension_semantics<parallel>], iteration_bounds = array<i64: 1>, scalar_prefetch = 0 : i64, scratch_operands = 0 : i64, tpu.core_type = #tpu.core_type<tc>, window_params = [{transform_indices = @transform_0, window_bounds = array<i64: 32, 32>}, {pipeline_mode = #tpu.pipeline_mode<synchronous>, transform_indices = @transform_1, window_bounds = array<i64: 32, 32>}, {pipeline_mode = #tpu.pipeline_mode<synchronous>, transform_indices = @transform_2, window_bounds = array<i64: 1, 32>}, {pipeline_mode = #tpu.pipeline_mode<synchronous>, transform_indices = @transform_3, window_bounds = array<i64: 1, 32>}, {transform_indices = @transform_4, window_bounds = array<i64: 1, 1>}, {transform_indices = @transform_5, window_bounds = array<i64: 1>}, {transform_indices = @transform_6, window_bounds = array<i64: 1, 1, 32>}]} {
    %c0 = arith.constant 0 : index
    %c0_0 = arith.constant 0 : index
    %0 = vector.load %arg1[%c0, %c0_0] : memref<32x32xf32, #tpu.memory_space<vmem>>, vector<32x32xf32>
    %c0_1 = arith.constant 0 : index
    %c0_2 = arith.constant 0 : index
    %1 = vector.load %arg2[%c0_1, %c0_2] : memref<32x32xf32, #tpu.memory_space<vmem>>, vector<32x32xf32>
    %cst = arith.constant dense<0.000000e+00> : vector<32x32xf32>
    %2 = tpu.matmul %0, %1, %cst {dimension_numbers = #tpu.dot_dimension_numbers<[1], [0], [0], [1], [0, 0, 1, 1], [], []>, precision = #tpu.contract_precision<fp32>} : vector<32x32xf32>, vector<32x32xf32>, vector<32x32xf32> -> vector<32x32xf32>
    %c0_3 = arith.constant 0 : index
    %c0_4 = arith.constant 0 : index
    %3 = vector.load %arg3[%c0_3, %c0_4] : memref<1x32xf32, #tpu.memory_space<vmem>>, vector<1x32xf32>
    %4 = vector.broadcast %3 : vector<1x32xf32> to vector<32x32xf32>
    %5 = arith.addf %2, %4 : vector<32x32xf32>
    %cst_5 = arith.constant 0.000000e+00 : f32
    %6 = vector.broadcast %cst_5 : f32 to vector<32x32xf32>
    %7 = arith.maximumf %5, %6 : vector<32x32xf32>
    %c0_6 = arith.constant 0 : index
    %c0_7 = arith.constant 0 : index
    %8 = vector.load %arg4[%c0_6, %c0_7] : memref<1x32xf32, #tpu.memory_space<vmem>>, vector<1x32xf32>
    %cst_8 = arith.constant dense<0.000000e+00> : vector<1x32xf32>
    %9 = tpu.matmul %8, %7, %cst_8 {dimension_numbers = #tpu.dot_dimension_numbers<[1], [1], [0], [0], [0, 0, 1, 0], [], []>, precision = #tpu.contract_precision<fp32>} : vector<1x32xf32>, vector<32x32xf32>, vector<1x32xf32> -> vector<1x32xf32>
    %c0_9 = arith.constant 0 : index
    %c0_10 = arith.constant 0 : index
    %10 = memref.load %arg5[%c0_9, %c0_10] : memref<1x1xf32, #tpu.memory_space<smem>>
    %11 = vector.broadcast %10 : f32 to vector<1x32xf32>
    %12 = arith.addf %9, %11 : vector<1x32xf32>
    %c0_11 = arith.constant 0 : index
    %c0_12 = arith.constant 0 : index
    %c0_13 = arith.constant 0 : index
    %13 = vector.load %arg7[%c0_11, %c0_12, %c0_13] : memref<1x1x32xf32, #tpu.memory_space<vmem>>, vector<1x1x32xf32>
    %14 = vector.shape_cast %13 : vector<1x1x32xf32> to vector<1x32xf32>
    %15 = vector.shape_cast %12 : vector<1x32xf32> to vector<1x1x32xf32>
    tpu.vector_store %arg7[%c0_11, %c0_12, %c0_13], %15 {strides = array<i32>} : memref<1x1x32xf32, #tpu.memory_space<vmem>>, vector<1x1x32xf32>,
    return
  }
  func.func @transform_0(%arg0: i32) -> (i32, i32) {
    %c0_i32 = arith.constant 0 : i32
    %c0_i32_0 = arith.constant 0 : i32
    return %arg0, %c0_i32 : i32, i32
  }
  func.func @transform_1(%arg0: i32) -> (i32, i32) {
    %c0_i32 = arith.constant 0 : i32
    %c0_i32_0 = arith.constant 0 : i32
    %c0_i32_1 = arith.constant 0 : i32
    return %c0_i32, %c0_i32_0 : i32, i32
  }
  func.func @transform_2(%arg0: i32) -> (i32, i32) {
    %c0_i32 = arith.constant 0 : i32
    %c0_i32_0 = arith.constant 0 : i32
    %c0_i32_1 = arith.constant 0 : i32
    return %c0_i32, %c0_i32_0 : i32, i32
  }
  func.func @transform_3(%arg0: i32) -> (i32, i32) {
    %c0_i32 = arith.constant 0 : i32
    %c0_i32_0 = arith.constant 0 : i32
    %c0_i32_1 = arith.constant 0 : i32
    return %c0_i32, %c0_i32_0 : i32, i32
  }
  func.func @transform_4(%arg0: i32) -> (i32, i32) {
    %c0_i32 = arith.constant 0 : i32
    %c0_i32_0 = arith.constant 0 : i32
    %c0_i32_1 = arith.constant 0 : i32
    return %c0_i32, %c0_i32_0 : i32, i32
  }
  func.func @transform_5(%arg0: i32) -> i32 {
    %c0_i32 = arith.constant 0 : i32
    %c0_i32_0 = arith.constant 0 : i32
    return %c0_i32 : i32
  }
  func.func @transform_6(%arg0: i32) -> (i32, i32, i32) {
    %c0_i32 = arith.constant 0 : i32
    %c0_i32_0 = arith.constant 0 : i32
    %c0_i32_1 = arith.constant 0 : i32
    return %arg0, %c0_i32, %c0_i32_0 : i32, i32, i32
  }
}

</mosaic_0001>

<bundles_post_ra>
// kernel: tpu_custom_call.1
= control target key start
LH: loop header
LB: loop body
LE: loop exit
PB: predicated region body
PF: predicated region fallthrough
CT: control target
= control target key end

     0   :  { %13 = vsyncpa [#allocation5], 0  ;;  %s1771_s0 = inlined_call_operand.hbm [shape: f32[32,32], index: 0, kind: input, shape index: {}]   ;;  %s1772_s1 = inlined_call_operand.hbm [shape: f32[32,32], index: 1, kind: input, shape index: {}]   ;;  %s1773_s2 = inlined_call_operand.vmem [shape: f32[1,32], index: 2, kind: input, shape index: {}]   ;;  %s1774_s3 = inlined_call_operand.vmem [shape: f32[1,32], index: 3, kind: input, shape index: {}]   ;;  %s1775_s4 = inlined_call_operand.<no memory space> [shape: f32[1,1], index: 4, kind: input, shape index: {}]   ;;  %s1776_s5 = inlined_call_operand.<no memory space> [shape: s32[1], index: 5, kind: input, shape index: {}]   ;;  %s1777_s6 = inlined_call_operand.hbm [shape: f32[1,1,32], index: 6, kind: output, shape index: {}]  }
   0x1   :  { %14 = vsyncpa [#allocation8], 0 }
   0x2   :  { %15 = vsyncpa [#allocation6], 0  ;;  %s1523_s21 = smov [#allocation4]  }
   0x3   :  { %s21_s22 = sshll.u32 %s1523_s21, 4  ;;  %s22_s22 = int_to_ptr.vmem [resolvable:$true] %s21_s22 }
   0x4   :  { %s1465_s23 = scalar_lea.vmem %s22_s22, 512  ;;  %p1470_p1 = scmp.lt.s32.totalorder %s22_s22, %s22_s22 }
   0x5   :  { %p1466_p0 = scmp.ne.s32.totalorder %s22_s22, %s1465_s23  ;;  %p1471_p2 = scmp.lt.s32.totalorder %s1465_s23, %s1465_s23 }
   0x7   :  { %p1472_p3 = por %p1471_p2, %p1470_p1 }
   0x9   :  { %p1473_p4 = pnand %p1472_p3, %p1466_p0 }
   0xb   :  { %1476 = shalt.err (!%p1473_p4)
}
   0xc   :  { %s1524_s24 = smov 128   ;;  %s1525_s25 = smov 8  }
   0xd   :  { %27 = dma.hbm_to_vmem [thread:$0]  %s1771_s0, 512, %s22_s22, [#allocation5], %s1524_s24, %s1524_s24, %s1525_s25  }
   0xe   :  { %s1526_s27 = smov [#allocation7]  }
   0xf   :  { %s33_s28 = sshll.u32 %s1526_s27, 4  ;;  %s34_s28 = int_to_ptr.vmem [resolvable:$true] %s33_s28 }
  0x10   :  { %s1485_s29 = scalar_lea.vmem %s34_s28, 512  ;;  %p1490_p6 = scmp.lt.s32.totalorder %s34_s28, %s34_s28 }
  0x11   :  { %p1486_p5 = scmp.ne.s32.totalorder %s34_s28, %s1485_s29  ;;  %p1491_p7 = scmp.lt.s32.totalorder %s1485_s29, %s1485_s29 }
  0x13   :  { %p1492_p8 = por %p1491_p7, %p1490_p6 }
  0x15   :  { %p1493_p9 = pnand %p1492_p8, %p1486_p5 }
  0x17   :  { %1496 = shalt.err (!%p1493_p9)
}
  0x18   :  { %39 = dma.hbm_to_vmem [thread:$0]  %s1772_s1, 512, %s34_s28, [#allocation8], %s1524_s24, %s1524_s24, %s1525_s25  }
  0x19   :  { %1517 = dma.done.wait [#allocation5], 512  }
  0x1a   :  { %1518 = vsyncadd [#allocation5], 4294966784 }
  0x1b   :  { %1519 = dma.done.wait [#allocation8], 512  }
  0x1c   :  { %1520 = vsyncadd [#allocation8], 4294966784  ;;  %vm69_vm0 = vcmask 261120   ;;  %v61_v0 = vld [vmem:[#allocation7 + $0x18] sm:$0xff]  ;;  %v60_v1 = vld [vmem:[#allocation7 + $0x10] sm:$0xff]  ;;  %v1527_v52 = vmov 0.0  }
  0x1d   :  { %v59_v2 = vld [vmem:[#allocation7 + $0x8] sm:$0xff]  ;;  %v1571_v3 = vand.u32 4294901760, %v61_v0  ;;  %v1573_v4 = vand.u32 4294901760, %v60_v1  ;;  %v58_v6 = vld [vmem:[#allocation7] sm:$0xff]  ;;  %v56_v12 = vld [vmem:[#allocation4 + $0x10] sm:$0xff]  ;;  %vm1528_vm1 = vmmov 0  }
  0x1e   :  { %v1575_v5 = vand.u32 4294901760, %v59_v2  ;;  %v54_v7 = vld [vmem:[#allocation4] sm:$0xff]  ;;  %v55_v8 = vld [vmem:[#allocation4 + $0x8] sm:$0xff]  ;;  %v1577_v9 = vand.u32 4294901760, %v58_v6  ;;  %v57_v13 = vld [vmem:[#allocation4 + $0x18] sm:$0xff]  ;;  %v77_v19 = vsel %vm69_vm0, %v56_v12, 0 }
  0x1f   :  { %v71_v10 = vsel %vm69_vm0, %v54_v7, 0  ;;  %v74_v11 = vsel %vm69_vm0, %v55_v8, 0  ;;  %1300 = vmatprep.subr.mxu0 %v1571_v3  ;;  %v217_v14 = vsub.f32 %v61_v0, %v1571_v3  ;;  %v224_v17 = vsub.f32 %v60_v1, %v1573_v4  ;;  %v1221_v60 = vld [vmem:[%s1773_s2] ss:$0 sm:$0xff]  ;;  %s1529_s10 = smov [#allocation9]  }
  0x20   :  { %v1583_v15 = vand.u32 4294901760, %v71_v10  ;;  %v1585_v16 = vand.u32 4294901760, %v74_v11  ;;  %1301 = vmatpush3.msra.mxu0 %v1571_v3  ;;  %v231_v18 = vsub.f32 %v59_v2, %v1575_v5  ;;  %v80_v20 = vsel %vm69_vm0, %v57_v13, 0  ;;  %s1211_s11 = sshll.u32 %s1529_s10, 4  ;;  %s1212_s11 = int_to_ptr.vmem [resolvable:$true] %s1211_s11 }
  0x21   :  { %v238_v21 = vsub.f32 %v58_v6, %v1577_v9  ;;  %1302 = vmatprep.subr.mxu0 %v1573_v4  ;;  %v1594_v22 = vand.u32 4294901760, %v217_v14  ;;  %v1602_v25 = vand.u32 4294901760, %v224_v17  ;;  %v1608_v27 = vand.u32 4294901760, %v77_v19  ;;  %s1497_s12 = scalar_lea.vmem %s1212_s11, 16  ;;  %s1501_s13 = scalar_lea.vmem %s1212_s11, 32 }
  0x22   :  { %v1597_v23 = vsub.f32 %v71_v10, %v1583_v15  ;;  %v1600_v24 = vsub.f32 %v74_v11, %v1585_v16  ;;  %1322 = vmatprep.mubr.f32.mxu1 %v1583_v15  ;;  %1303 = vmatpush3.msra.mxu0 %v1573_v4  ;;  %v1606_v26 = vand.u32 4294901760, %v231_v18  ;;  %v1610_v28 = vand.u32 4294901760, %v80_v20  ;;  %p1498_p10 = scmp.ne.s32.totalorder %s1212_s11, %s1497_s12  ;;  %p1502_p11 = scmp.lt.s32.totalorder %s1212_s11, %s1212_s11 }
  0x23   :  { %v1612_v29 = vand.u32 4294901760, %v238_v21  ;;  %1304 = vmatprep.subr.mxu0 %v1575_v5  ;;  %v219_v30 = vsub.f32 %v217_v14, %v1594_v22  ;;  %v226_v33 = vsub.f32 %v224_v17, %v1602_v25  ;;  %v1622_v35 = vsub.f32 %v77_v19, %v1608_v27  ;;  %p1503_p12 = scmp.lt.s32.totalorder %s1501_s13, %s1497_s12 }
  0x24   :  { %v153_v31 = vand.u32 4294901760, %v1597_v23  ;;  %v163_v32 = vand.u32 4294901760, %v1600_v24  ;;  %1305 = vmatpush3.msra.mxu0 %v1575_v5  ;;  %v233_v34 = vsub.f32 %v231_v18, %v1606_v26  ;;  %v1625_v36 = vsub.f32 %v80_v20, %v1610_v28 }
  0x25   :  { %1306 = vmatprep.subr.mxu0 %v1577_v9  ;;  %v220_v37 = vand.u32 4294901760, %v219_v30  ;;  %v227_v40 = vand.u32 4294901760, %v226_v33  ;;  %v173_v41 = vand.u32 4294901760, %v1622_v35  ;;  %v240_v43 = vsub.f32 %v238_v21, %v1612_v29  ;;  %p1504_p13 = por %p1503_p12, %p1502_p11 }
  0x26   :  { %v154_v38 = vsub.f32 %v1597_v23, %v153_v31  ;;  %v164_v39 = vsub.f32 %v1600_v24, %v163_v32  ;;  %1307 = vmatpush3.msra.mxu0 %v1577_v9  ;;  %v183_v42 = vand.u32 4294901760, %v1625_v36  ;;  %v234_v46 = vand.u32 4294901760, %v233_v34 }
  0x27   :  { %1314 = vmatprep.subr.mxu1 %v220_v37  ;;  %1328 = vmatprep.subr.mxu0 %v217_v14  ;;  %v174_v47 = vsub.f32 %v1622_v35, %v173_v41  ;;  %v241_v51 = vand.u32 4294901760, %v240_v43  ;;  %vm1203_vm2 = vcmask 253952   ;;  %p1505_p0 = pnand %p1504_p13, %p1498_p10 }
  0x28   :  { %v155_v44 = vand.u32 4294901760, %v154_v38  ;;  %v165_v45 = vand.u32 4294901760, %v164_v39  ;;  %1315 = vmatpush3.msra.mxu1 %v220_v37  ;;  %v184_v48 = vsub.f32 %v1625_v36, %v183_v42 }
  0x29   :  { %1316 = vmatprep.subr.mxu1 %v227_v40  ;;  %v175_v49 = vand.u32 4294901760, %v174_v47 }
  0x2a   :  { %1308 = vmatprep.mubr.f32.mxu0 %v155_v44  ;;  %1317 = vmatpush3.msra.mxu1 %v227_v40  ;;  %v185_v50 = vand.u32 4294901760, %v184_v48 }
  0x2b   :  { %1309 = vmatmul.mubr.f32.vlgmr.msra.gmra.mxu0 %v165_v45  ;;  %1318 = vmatprep.subr.mxu1 %v234_v46 }
  0x2c   :  { %1329 = vmatpush3.msra.mxu0 %v217_v14  ;;  %1311 = vmatprep.mubr.f32.mxu0 %v175_v49 }
  0x2d   :  { %1330 = vmatprep.subr.mxu0 %v224_v17  ;;  %1319 = vmatpush3.msra.mxu1 %v234_v46 }
  0x2e   :  { %1331 = vmatpush3.msra.mxu0 %v224_v17  ;;  %1320 = vmatprep.subr.mxu1 %v241_v51 }
  0x2f   :  { %1312 = vmatmul.mubr.f32.gmra.mxu0 %v185_v50  ;;  %1332 = vmatprep.subr.mxu0 %v231_v18 }
  0x30   :  { %1321 = vmatpush3.msra.mxu1 %v241_v51  ;;  %1333 = vmatpush3.msra.mxu0 %v231_v18 }
  0x31   :  { %1323 = vmatmul.mubr.f32.vlgmr.msra.gmra.mxu1 %v1585_v16  ;;  %1334 = vmatprep.subr.mxu0 %v238_v21 }
  0x32   :  { %1342 = vmatprep.subr.mxu1 %v1571_v3  ;;  %1335 = vmatpush3.msra.mxu0 %v238_v21 }
  0x33   :  { %1336 = vmatprep.mubr.f32.mxu0 %v1597_v23  ;;  %1343 = vmatpush3.msra.mxu1 %v1571_v3 }
  0x34   :  { %1337 = vmatmul.mubr.f32.vlgmr.msra.gmra.mxu0 %v1600_v24  ;;  %1344 = vmatprep.subr.mxu1 %v1573_v4 }
  0x35   :  { %1356 = vmatprep.subr.mxu0 %v1594_v22  ;;  %1325 = vmatprep.mubr.f32.mxu1 %v1608_v27 }
  0x36   :  { %1345 = vmatpush3.msra.mxu1 %v1573_v4  ;;  %1357 = vmatpush3.msra.mxu0 %v1594_v22 }
  0x37   :  { %1326 = vmatmul.mubr.f32.gmra.mxu1 %v1610_v28  ;;  %1346 = vmatprep.subr.mxu1 %v1575_v5 }
  0x38   :  { %1358 = vmatprep.subr.mxu0 %v1602_v25  ;;  %1339 = vmatprep.mubr.f32.mxu0 %v1622_v35 }
  0x39   :  { %1347 = vmatpush3.msra.mxu1 %v1575_v5  ;;  %1359 = vmatpush3.msra.mxu0 %v1602_v25 }
  0x3a   :  { %1348 = vmatprep.subr.mxu1 %v1577_v9  ;;  %1340 = vmatmul.mubr.f32.gmra.mxu0 %v1625_v36 }
  0x3b   :  { %1360 = vmatprep.subr.mxu0 %v1606_v26  ;;  %1349 = vmatpush3.msra.mxu1 %v1577_v9 }
  0x3c   :  { %1350 = vmatprep.mubr.f32.mxu1 %v153_v31  ;;  %1361 = vmatpush3.msra.mxu0 %v1606_v26  ;;  %v700_v26 = vld [vmem:[%s1774_s3] sm:$0x1] }
  0x3d   :  { %1351 = vmatmul.mubr.f32.vlgmr.msra.gmra.mxu1 %v163_v32  ;;  %1362 = vmatprep.subr.mxu0 %v1612_v29  ;;  %v704_v35 = vsel %vm69_vm0, %v700_v26, 0 }
  0x3e   :  { %1370 = vmatprep.subr.mxu1 %v1571_v3  ;;  %1363 = vmatpush3.msra.mxu0 %v1612_v29  ;;  %v1696_v40 = vand.u32 4294901760, %v704_v35 }
  0x3f   :  { %1364 = vmatprep.mubr.f32.mxu0 %v1583_v15  ;;  %1371 = vmatpush3.msra.mxu1 %v1571_v3 }
  0x40   :  { %1365 = vmatmul.mubr.f32.vlgmr.msra.gmra.mxu0 %v1585_v16  ;;  %1372 = vmatprep.subr.mxu1 %v1573_v4  ;;  %v1707_v51 = vsub.f32 %v704_v35, %v1696_v40 }
  0x41   :  { %1353 = vmatprep.mubr.f32.mxu1 %v173_v41  ;;  %1373 = vmatpush3.msra.mxu1 %v1573_v4 }
  0x42   :  { %1367 = vmatprep.mubr.f32.mxu0 %v1608_v27  ;;  %1354 = vmatmul.mubr.f32.gmra.mxu1 %v183_v42 }
  0x43   :  { %1374 = vmatprep.subr.mxu1 %v1575_v5  ;;  %1378 = vmatprep.mubr.f32.mxu1 %v1583_v15 }
  0x44   :  { %1375 = vmatpush3.msra.mxu1 %v1575_v5  ;;  %1368 = vmatmul.mubr.f32.gmra.mxu0 %v1610_v28 }
  0x45   :  { %1376 = vmatprep.subr.mxu1 %v1577_v9  ;;  %1384 = vmatprep.subr.mxu0 %v1527_v52 }
  0x46   :  { %1377 = vmatpush3.msra.mxu1 %v1577_v9  ;;  %1392 = vmatprep.mubr.msk.f32.mxu0 %vm1528_vm1, %v1527_v52 }
  0x47   :  { %1379 = vmatmul.mubr.f32.vlgmr.msra.gmra.mxu1 %v1585_v16  ;;  %1395 = vmatprep.subr.mxu1 %v1527_v52 }
  0x48   :  { %1381 = vmatprep.mubr.f32.mxu1 %v1608_v27 }
  0x4b   :  { %1382 = vmatmul.mubr.f32.gmra.mxu1 %v1610_v28 }
  0x4c   :  { %1403 = vmatprep.mubr.msk.f32.mxu1 %vm1528_vm1, %v1527_v52 }
  0xeb   :  { %v1310_v53 = vpop.f32.mrf.mxu0 }
  0xec   :  { %v168_v63 = vadd.f32 %v1310_v53, %v1221_v60 }
  0xed   :  { %v157_v54 = vpop.f32.mrf.mxu0 }
  0xee   :  { %v158_v2 = vadd.f32 %v1221_v60, %v157_v54 }
  0xef   :  { %v1313_v55 = vpop.f32.mrf.mxu0 }
  0xf0   :  { %v188_v3 = vadd.f32 %v1313_v55, %v1221_v60 }
  0xf1   :  { %v177_v56 = vpop.f32.mrf.mxu0  ;;  %v1324_v57 = vpop.f32.mrf.mxu1 }
  0xf2   :  { %v285_v4 = vadd.f32 %v1324_v57, %v168_v63  ;;  %v178_v9 = vadd.f32 %v1221_v60, %v177_v56 }
  0xf3   :  { %v278_v58 = vpop.f32.mrf.mxu1 }
  0xf4   :  { %v1338_v59 = vpop.f32.mrf.mxu0  ;;  %v279_v7 = vadd.f32 %v278_v58, %v158_v2 }
  0xf5   :  { %v384_v10 = vadd.f32 %v1338_v59, %v285_v4  ;;  %v789_v59 = vand.u32 4294901760, %v1707_v51 }
  0xf6   :  { %v376_v62 = vpop.f32.mrf.mxu0 }
  0xf7   :  { %v1327_v61 = vpop.f32.mrf.mxu1  ;;  %v377_v13 = vadd.f32 %v376_v62, %v279_v7  ;;  %v790_v2 = vsub.f32 %v1707_v51, %v789_v59 }
  0xf8   :  { %v297_v11 = vadd.f32 %v1327_v61, %v188_v3 }
  0xf9   :  { %v290_v0 = vpop.f32.mrf.mxu1 }
  0xfa   :  { %v1341_v1 = vpop.f32.mrf.mxu0  ;;  %v291_v14 = vadd.f32 %v290_v0, %v178_v9 }
  0xfb   :  { %v398_v18 = vadd.f32 %v1341_v1, %v297_v11 }
  0xfc   :  { %v390_v5 = vpop.f32.mrf.mxu0 }
  0xfd   :  { %v1352_v6 = vpop.f32.mrf.mxu1  ;;  %v391_v22 = vadd.f32 %v390_v5, %v291_v14 }
  0xfe   :  { %v483_v15 = vadd.f32 %v1352_v6, %v384_v10  ;;  %v791_v6 = vand.u32 4294901760, %v790_v2 }
  0xff   :  { %v474_v8 = vpop.f32.mrf.mxu1 }
 0x100   :  { %v1366_v12 = vpop.f32.mrf.mxu0  ;;  %v475_v19 = vadd.f32 %v474_v8, %v377_v13 }
 0x101   :  { %v588_v23 = vadd.f32 %v1366_v12, %v483_v15 }
 0x102   :  { %v581_v16 = vpop.f32.mrf.mxu0  ;;  %v1355_v17 = vpop.f32.mrf.mxu1 }
 0x103   :  { %v499_v24 = vadd.f32 %v1355_v17, %v398_v18  ;;  %v582_v27 = vadd.f32 %v581_v16, %v475_v19  ;;  %v702_v17 = vstv %s1775_s4 }
 0x104   :  { %v490_v20 = vpop.f32.mrf.mxu1  ;;  %v1369_v21 = vpop.f32.mrf.mxu0 }
 0x105   :  { %v491_v28 = vadd.f32 %v490_v20, %v391_v22  ;;  %v600_v32 = vadd.f32 %v1369_v21, %v499_v24 }
 0x106   :  { %v593_v30 = vpop.f32.mrf.mxu0 }
 0x107   :  { %v1380_v25 = vpop.f32.mrf.mxu1  ;;  %v594_v37 = vadd.f32 %v593_v30, %v491_v28 }
 0x108   :  { %v681_v29 = vadd.f32 %v1380_v25, %v588_v23 }
 0x109   :  { %v674_v31 = vpop.f32.mrf.mxu1 }
 0x10a   :  { %v697_v33 = vmax.f32 %v681_v29, 0.0  ;;  %v675_v34 = vadd.f32 %v674_v31, %v582_v27 }
 0x10b   :  { %v1383_v36 = vpop.f32.mrf.mxu1 }
 0x10c   :  { %v693_v38 = vadd.f32 %v1383_v36, %v600_v32  ;;  %v710_v41 = vsel %vm69_vm0, %v697_v33, 0  ;;  %v696_v42 = vmax.f32 %v675_v34, 0.0 }
 0x10d   :  { %v686_v39 = vpop.f32.mrf.mxu1  ;;  %v1700_v47 = vand.u32 4294901760, %v710_v41 }
 0x10e   :  { %v699_v43 = vmax.f32 %v693_v38, 0.0  ;;  %v687_v44 = vadd.f32 %v686_v39, %v594_v37  ;;  %v707_v49 = vsel %vm69_vm0, %v696_v42, 0 }
 0x10f   :  { %v837_v55 = vsub.f32 %v710_v41, %v1700_v47  ;;  %v1715_v56 = vand.u32 4294901760, %v707_v49 }
 0x110   :  { %v716_v45 = vsel %vm69_vm0, %v699_v43, 0  ;;  %v698_v46 = vmax.f32 %v687_v44, 0.0 }
 0x111   :  { %v1702_v48 = vand.u32 4294901760, %v716_v45  ;;  %v838_v62 = vand.u32 4294901760, %v837_v55  ;;  %v844_v63 = vsub.f32 %v707_v49, %v1715_v56 }
 0x112   :  { %v713_v50 = vsel %vm69_vm0, %v698_v46, 0 }
 0x113   :  { %v823_v53 = vsub.f32 %v716_v45, %v1702_v48  ;;  %v1710_v54 = vand.u32 4294901760, %v713_v50  ;;  %1385 = vmatpush3.xpose.msra.mxu0 %v1702_v48  ;;  %v845_v3 = vand.u32 4294901760, %v844_v63  ;;  %v839_v5 = vsub.f32 %v837_v55, %v838_v62 }
 0x114   :  { %1386 = vmatprep.subr.mxu0 %v1527_v52 }
 0x115   :  { %v824_v57 = vand.u32 4294901760, %v823_v53  ;;  %v830_v58 = vsub.f32 %v713_v50, %v1710_v54  ;;  %v840_v7 = vand.u32 4294901760, %v839_v5  ;;  %v846_v8 = vsub.f32 %v844_v63, %v845_v3 }
 0x117   :  { %v831_v60 = vand.u32 4294901760, %v830_v58  ;;  %1387 = vmatpush3.xpose.msra.mxu0 %v1710_v54  ;;  %v825_v61 = vsub.f32 %v823_v53, %v824_v57  ;;  %v847_v9 = vand.u32 4294901760, %v846_v8 }
 0x118   :  { %1388 = vmatprep.subr.mxu0 %v1527_v52 }
 0x119   :  { %v826_v0 = vand.u32 4294901760, %v825_v61  ;;  %v832_v1 = vsub.f32 %v830_v58, %v831_v60 }
 0x11b   :  { %1389 = vmatpush3.xpose.msra.mxu0 %v1700_v47  ;;  %1396 = vmatpush3.xpose.msra.mxu1 %v826_v0  ;;  %v833_v4 = vand.u32 4294901760, %v832_v1 }
 0x11c   :  { %1390 = vmatprep.subr.mxu0 %v1527_v52  ;;  %1397 = vmatprep.subr.mxu1 %v1527_v52 }
 0x11f   :  { %1391 = vmatpush3.xpose.msra.mxu0 %v1715_v56  ;;  %1398 = vmatpush3.xpose.msra.mxu1 %v833_v4 }
 0x120   :  { %1399 = vmatprep.subr.mxu1 %v1527_v52  ;;  %1406 = vmatprep.subr.mxu0 %v1527_v52 }
 0x122   :  { %1393 = vmatmul.mubr.f32.vlgmr.msra.gmra.mxu0 %v791_v6 }
 0x123   :  { %1400 = vmatpush3.xpose.msra.mxu1 %v840_v7  ;;  %1407 = vmatpush3.xpose.msra.mxu0 %v823_v53 }
 0x124   :  { %1401 = vmatprep.subr.mxu1 %v1527_v52  ;;  %1408 = vmatprep.subr.mxu0 %v1527_v52 }
 0x125   :  { %1414 = vmatprep.mubr.msk.f32.mxu0 %vm1528_vm1, %v1527_v52 }
 0x127   :  { %1402 = vmatpush3.xpose.msra.mxu1 %v847_v9  ;;  %1409 = vmatpush3.xpose.msra.mxu0 %v830_v58 }
 0x128   :  { %1410 = vmatprep.subr.mxu0 %v1527_v52  ;;  %1417 = vmatprep.subr.mxu1 %v1527_v52 }
 0x12a   :  { %1404 = vmatmul.mubr.f32.vlgmr.msra.gmra.mxu1 %v1696_v40 }
 0x12b   :  { %1411 = vmatpush3.xpose.msra.mxu0 %v837_v55  ;;  %1418 = vmatpush3.xpose.msra.mxu1 %v1702_v48 }
 0x12c   :  { %1412 = vmatprep.subr.mxu0 %v1527_v52  ;;  %1419 = vmatprep.subr.mxu1 %v1527_v52 }
 0x12d   :  { %1425 = vmatprep.mubr.msk.f32.mxu1 %vm1528_vm1, %v1527_v52 }
 0x12f   :  { %1413 = vmatpush3.xpose.msra.mxu0 %v844_v63  ;;  %1420 = vmatpush3.xpose.msra.mxu1 %v1710_v54 }
 0x130   :  { %1421 = vmatprep.subr.mxu1 %v1527_v52  ;;  %1428 = vmatprep.subr.mxu0 %v1527_v52 }
 0x132   :  { %1415 = vmatmul.mubr.f32.vlgmr.msra.gmra.mxu0 %v1707_v51 }
 0x133   :  { %1422 = vmatpush3.xpose.msra.mxu1 %v1700_v47  ;;  %1429 = vmatpush3.xpose.msra.mxu0 %v824_v57 }
 0x134   :  { %1423 = vmatprep.subr.mxu1 %v1527_v52  ;;  %1430 = vmatprep.subr.mxu0 %v1527_v52 }
 0x135   :  { %1436 = vmatprep.mubr.msk.f32.mxu0 %vm1528_vm1, %v1527_v52 }
 0x137   :  { %1424 = vmatpush3.xpose.msra.mxu1 %v1715_v56  ;;  %1431 = vmatpush3.xpose.msra.mxu0 %v831_v60 }
 0x138   :  { %1432 = vmatprep.subr.mxu0 %v1527_v52  ;;  %1439 = vmatprep.subr.mxu1 %v1527_v52 }
 0x13a   :  { %1426 = vmatmul.mubr.f32.vlgmr.msra.gmra.mxu1 %v789_v59 }
 0x13b   :  { %1433 = vmatpush3.xpose.msra.mxu0 %v838_v62  ;;  %1440 = vmatpush3.xpose.msra.mxu1 %v1702_v48 }
 0x13c   :  { %1434 = vmatprep.subr.mxu0 %v1527_v52  ;;  %1441 = vmatprep.subr.mxu1 %v1527_v52 }
 0x13d   :  { %1447 = vmatprep.mubr.msk.f32.mxu1 %vm1528_vm1, %v1527_v52 }
 0x13f   :  { %1435 = vmatpush3.xpose.msra.mxu0 %v845_v3  ;;  %1442 = vmatpush3.xpose.msra.mxu1 %v1710_v54 }
 0x140   :  { %1443 = vmatprep.subr.mxu1 %v1527_v52 }
 0x142   :  { %1437 = vmatmul.mubr.f32.vlgmr.msra.gmra.mxu0 %v1696_v40 }
 0x143   :  { %1444 = vmatpush3.xpose.msra.mxu1 %v1700_v47 }
 0x144   :  { %1445 = vmatprep.subr.mxu1 %v1527_v52 }
 0x147   :  { %1446 = vmatpush3.xpose.msra.mxu1 %v1715_v56 }
 0x14a   :  { %1448 = vmatmul.mubr.f32.vlgmr.msra.gmra.mxu1 %v1696_v40 }
 0x1e2   :  { %v793_v10 = vpop.f32.mrf.mxu0 }
 0x1e3   :  { %v794_v19 = vadd.f32 %v793_v10, %v702_v17 }
 0x1e4   :  { %v1394_v11 = vpop.f32.mrf.mxu0 }
 0x1ea   :  { %v884_v12 = vpop.f32.mrf.mxu1 }
 0x1eb   :  { %v885_v21 = vadd.f32 %v884_v12, %v794_v19 }
 0x1ec   :  { %v1405_v13 = vpop.f32.mrf.mxu1 }
 0x1f2   :  { %v964_v14 = vpop.f32.mrf.mxu0 }
 0x1f3   :  { %v965_v22 = vadd.f32 %v964_v14, %v885_v21 }
 0x1f4   :  { %v1416_v15 = vpop.f32.mrf.mxu0 }
 0x1fa   :  { %v1041_v16 = vpop.f32.mrf.mxu1 }
 0x1fb   :  { %v1042_v23 = vadd.f32 %v1041_v16, %v965_v22 }
 0x1fc   :  { %v1427_v18 = vpop.f32.mrf.mxu1 }
 0x202   :  { %v1124_v20 = vpop.f32.mrf.mxu0 }
 0x203   :  { %v1125_v24 = vadd.f32 %v1124_v20, %v1042_v23 }
 0x204   :  { %v1438_v52 = vpop.f32.mrf.mxu0 }
 0x20a   :  { %v1199_v25 = vpop.f32.mrf.mxu1 }
 0x20b   :  { %v1200_v26 = vadd.f32 %v1199_v25, %v1125_v24 }
 0x20c   :  { %v1449_v27 = vpop.f32.mrf.mxu1 }
 0x20d   :  { %1204 = vst.msk [vmem:[#allocation9] sm:$0x1] %vm1203_vm2, %v1200_v26 }
 0x20e   :  { %1508 = shalt.err (!%p1505_p0)
}
 0x20f   :  { %1214 = dma.vmem_to_hbm [thread:$0]  %s1212_s11, 16, %s1777_s6, [#allocation6]  }
 0x210   :  { %1521 = dma.done.wait [#allocation6], 16  }
 0x211   :  { %1522 = vsyncadd [#allocation6], 4294967280 }
 0x212   :  { %1218 = vsyncpa [#allocation5], 1 }
 0x213   :  { %1219 = vsyncpa [#allocation8], 1 }
 0x214   :  { %1220 = vsyncpa [#allocation6], 1 }

</bundles_post_ra>
